<compile_context>
chip_gen: v7x
topology: tpu7x:2x2x1
jax: 0.10.0
libtpu: 0.0.40
codegen_flags: <defaults>
</compile_context>

<pallas_src>
import functools

import jax
import jax.numpy as jnp
from jax.experimental import pallas as pl
from jax.experimental.pallas import tpu as pltpu


def encoder_kernel(x_ref, w1_ref, b1_ref, w2_ref, b2_ref, o_ref):
    # Two fused MXU matmuls with f32 accumulation; bias-add + ReLU in VMEM.
    h = jnp.dot(x_ref[...], w1_ref[...], preferred_element_type=jnp.float32)
    h = jnp.maximum(h + b1_ref[...], 0.0)                 # (tm, 512) f32
    h = h.astype(w2_ref.dtype)                            # bf16 operand for 2nd MXU pass
    o = jnp.dot(h, w2_ref[...], preferred_element_type=jnp.float32)
    o_ref[...] = jnp.maximum(o + b2_ref[...], 0.0).astype(o_ref.dtype)


def _round_up(x, m):
    return ((x + m - 1) // m) * m


def _pick_tm(batch_padded):
    """Batch tile: fill the MXU, keep the grid >= 2 when the batch allows
    (v7x has 2 TensorCores); tiny batches run as one resident grid step."""
    if batch_padded <= 256:
        return batch_padded
    tm = 512
    while tm > 256 and batch_padded // tm < 2:
        tm //= 2
    return tm


@functools.partial(jax.jit, static_argnames=("tm", "compute_dtype"))
def encoder_forward(x, w1, b1, w2, b2, *, tm=None, compute_dtype=jnp.bfloat16):
    """x: (B, num_inputs) f32; w1: (num_inputs, 512); w2: (512, 256).
    Returns (B, 256) f32."""
    B, num_inputs = x.shape
    hidden = w1.shape[1]
    embed = w2.shape[1]

    # --- wrapper-side layout prep (pure plumbing, fused by XLA) -------------
    # Zero-pad the first matmul's contraction dim to a multiple of 128 so the
    # x tile is lane-dense and the MXU K dimension is fully used.
    k_pad = _round_up(max(num_inputs, 128), 128)
    if k_pad != num_inputs:
        x = jnp.pad(x, ((0, 0), (0, k_pad - num_inputs)))
        w1 = jnp.pad(w1, ((0, k_pad - num_inputs), (0, 0)))

    # Pad the batch to a sublane multiple, then pick / honor the batch tile.
    b_pad = _round_up(B, 8)
    if tm is None:
        tm = _pick_tm(b_pad)
    b_pad = _round_up(b_pad, tm)
    if b_pad != B:
        x = jnp.pad(x, ((0, b_pad - B), (0, 0)))

    # bf16 weights/activations (full-rate MXU on v6e/v7x); biases stay f32 and
    # both matmuls accumulate in f32 via preferred_element_type.
    x = x.astype(compute_dtype)
    w1 = w1.astype(compute_dtype)
    w2 = w2.astype(compute_dtype)
    b1 = b1.reshape(1, hidden).astype(jnp.float32)
    b2 = b2.reshape(1, embed).astype(jnp.float32)

    grid = (b_pad // tm,)

    # Raise the scoped-VMEM limit only if this tile configuration needs it
    # (mostly v5e's 16 MiB default with a very large user-supplied tm).
    itemsize = jnp.dtype(compute_dtype).itemsize
    vmem_est = (2 * (tm * k_pad * itemsize + tm * embed * 4)          # x / out tiles (dbl-buffered)
                + 2 * (k_pad * hidden + hidden * embed) * itemsize    # resident weights (dbl-buffered)
                + 2 * (hidden + embed) * 4)                           # biases
    vmem_limit = (int(min(2 * vmem_est, 96 * 1024 * 1024))
                  if vmem_est > 12 * 1024 * 1024 else None)

    out = pl.pallas_call(
        encoder_kernel,
        out_shape=jax.ShapeDtypeStruct((b_pad, embed), jnp.float32),
        grid_spec=pltpu.PrefetchScalarGridSpec(
            num_scalar_prefetch=0,
            grid=grid,
            in_specs=[
                pl.BlockSpec((tm, k_pad), lambda i: (i, 0)),        # x tile
                pl.BlockSpec((k_pad, hidden), lambda i: (0, 0)),    # W1 (resident)
                pl.BlockSpec((1, hidden), lambda i: (0, 0)),        # b1
                pl.BlockSpec((hidden, embed), lambda i: (0, 0)),    # W2 (resident)
                pl.BlockSpec((1, embed), lambda i: (0, 0)),         # b2
            ],
            out_specs=pl.BlockSpec((tm, embed), lambda i: (i, 0)),
        ),
        compiler_params=pltpu.CompilerParams(
            dimension_semantics=("parallel",),
            vmem_limit_bytes=vmem_limit),
    )(x, w1, b1, w2, b2)

    return out[:B]


def encoder_reference_f32(x, w1, b1, w2, b2):
    h = jnp.maximum(x @ w1 + b1, 0.0)
    return jnp.maximum(h @ w2 + b2, 0.0)


def encoder_reference_bf16(x, w1, b1, w2, b2):
    # Same casts as the kernel (bf16 operands, f32 accumulation) for a tight check.
    h = jnp.dot(x.astype(jnp.bfloat16), w1.astype(jnp.bfloat16),
                preferred_element_type=jnp.float32) + b1
    h = jnp.maximum(h, 0.0).astype(jnp.bfloat16)
    o = jnp.dot(h, w2.astype(jnp.bfloat16),
                preferred_element_type=jnp.float32) + b2
    return jnp.maximum(o, 0.0)


if __name__ == "__main__":
    # Small shapes consistent with the module: Encoder(num_inputs=64, embed_size=256)
    batch = 8
    num_inputs = 64
    hidden = 512
    embed_size = 256

    key = jax.random.PRNGKey(0)
    kx, kw1, kb1, kw2, kb2 = jax.random.split(key, 5)

    x = jax.random.normal(kx, (batch, num_inputs), dtype=jnp.float32)

    # Deterministic parameter init (mimics nn.Linear's uniform(-1/sqrt(fan_in), ...)).
    lim1 = 1.0 / jnp.sqrt(jnp.float32(num_inputs))
    lim2 = 1.0 / jnp.sqrt(jnp.float32(hidden))
    w1 = jax.random.uniform(kw1, (num_inputs, hidden), jnp.float32, -lim1, lim1)
    b1 = jax.random.uniform(kb1, (1, hidden), jnp.float32, -lim1, lim1)
    w2 = jax.random.uniform(kw2, (hidden, embed_size), jnp.float32, -lim2, lim2)
    b2 = jax.random.uniform(kb2, (1, embed_size), jnp.float32, -lim2, lim2)

    out = encoder_forward(x, w1, b1, w2, b2)
    out = jax.block_until_ready(out)
    assert out.shape == (batch, embed_size)

    # Tight check vs. a reference with the same bf16-operand / f32-accum math.
    ref_bf16 = encoder_reference_bf16(x, w1, b1, w2, b2)
    assert jnp.allclose(out, ref_bf16, atol=2e-3, rtol=2e-3), "mismatch vs bf16 reference"

    # Loose check vs. the pure-f32 PyTorch-equivalent math.
    ref_f32 = encoder_reference_f32(x, w1, b1, w2, b2)
    assert jnp.allclose(out, ref_f32, atol=5e-2, rtol=5e-2), "mismatch vs f32 reference"

    print("KERNEL_OK")
</pallas_src>

<mosaic_0001>
module attributes {stable_mosaic.version = 11 : i64} {
  func.func @encoder_kernel(%arg0: i32, %arg1: memref<8x128xbf16, #tpu.memory_space<vmem>>, %arg2: memref<128x512xbf16, #tpu.memory_space<vmem>>, %arg3: memref<1x512xf32, #tpu.memory_space<vmem>>, %arg4: memref<512x256xbf16, #tpu.memory_space<vmem>>, %arg5: memref<1x256xf32, #tpu.memory_space<vmem>>, %arg6: memref<8x256xf32, #tpu.memory_space<vmem>>) attributes {dimension_semantics = [#tpu.dimension_semantics<parallel>], iteration_bounds = array<i64: 1>, scalar_prefetch = 0 : i64, scratch_operands = 0 : i64, tpu.core_type = #tpu.core_type<tc>, window_params = [{transform_indices = @transform_0, window_bounds = array<i64: 8, 128>}, {pipeline_mode = #tpu.pipeline_mode<synchronous>, transform_indices = @transform_1, window_bounds = array<i64: 128, 512>}, {pipeline_mode = #tpu.pipeline_mode<synchronous>, transform_indices = @transform_2, window_bounds = array<i64: 1, 512>}, {pipeline_mode = #tpu.pipeline_mode<synchronous>, transform_indices = @transform_3, window_bounds = array<i64: 512, 256>}, {pipeline_mode = #tpu.pipeline_mode<synchronous>, transform_indices = @transform_4, window_bounds = array<i64: 1, 256>}, {transform_indices = @transform_5, window_bounds = array<i64: 8, 256>}]} {
    %c0 = arith.constant 0 : index
    %c0_0 = arith.constant 0 : index
    %0 = vector.load %arg1[%c0, %c0_0] : memref<8x128xbf16, #tpu.memory_space<vmem>>, vector<8x128xbf16>
    %c0_1 = arith.constant 0 : index
    %c0_2 = arith.constant 0 : index
    %1 = vector.load %arg2[%c0_1, %c0_2] : memref<128x512xbf16, #tpu.memory_space<vmem>>, vector<128x512xbf16>
    %cst = arith.constant dense<0.000000e+00> : vector<8x512xf32>
    %2 = tpu.matmul %0, %1, %cst {dimension_numbers = #tpu.dot_dimension_numbers<[1], [0], [0], [1], [0, 0, 1, 1], [], []>} : vector<8x128xbf16>, vector<128x512xbf16>, vector<8x512xf32> -> vector<8x512xf32>
    %c0_3 = arith.constant 0 : index
    %c0_4 = arith.constant 0 : index
    %3 = vector.load %arg3[%c0_3, %c0_4] : memref<1x512xf32, #tpu.memory_space<vmem>>, vector<1x512xf32>
    %4 = vector.broadcast %3 : vector<1x512xf32> to vector<8x512xf32>
    %5 = arith.addf %2, %4 : vector<8x512xf32>
    %cst_5 = arith.constant 0.000000e+00 : f32
    %6 = vector.broadcast %cst_5 : f32 to vector<8x512xf32>
    %7 = arith.maximumf %5, %6 : vector<8x512xf32>
    %8 = arith.truncf %7 : vector<8x512xf32> to vector<8x512xbf16>
    %c0_6 = arith.constant 0 : index
    %c0_7 = arith.constant 0 : index
    %9 = vector.load %arg4[%c0_6, %c0_7] : memref<512x256xbf16, #tpu.memory_space<vmem>>, vector<512x256xbf16>
    %cst_8 = arith.constant dense<0.000000e+00> : vector<8x256xf32>
    %10 = tpu.matmul %8, %9, %cst_8 {dimension_numbers = #tpu.dot_dimension_numbers<[1], [0], [0], [1], [0, 0, 1, 1], [], []>} : vector<8x512xbf16>, vector<512x256xbf16>, vector<8x256xf32> -> vector<8x256xf32>
    %c0_9 = arith.constant 0 : index
    %c0_10 = arith.constant 0 : index
    %11 = vector.load %arg5[%c0_9, %c0_10] : memref<1x256xf32, #tpu.memory_space<vmem>>, vector<1x256xf32>
    %12 = vector.broadcast %11 : vector<1x256xf32> to vector<8x256xf32>
    %13 = arith.addf %10, %12 : vector<8x256xf32>
    %cst_11 = arith.constant 0.000000e+00 : f32
    %14 = vector.broadcast %cst_11 : f32 to vector<8x256xf32>
    %15 = arith.maximumf %13, %14 : vector<8x256xf32>
    %c0_12 = arith.constant 0 : index
    %c0_13 = arith.constant 0 : index
    %16 = vector.load %arg6[%c0_12, %c0_13] : memref<8x256xf32, #tpu.memory_space<vmem>>, vector<8x256xf32>
    tpu.vector_store %arg6[%c0_12, %c0_13], %15 {strides = array<i32>} : memref<8x256xf32, #tpu.memory_space<vmem>>, vector<8x256xf32>,
    return
  }
  func.func @transform_0(%arg0: i32) -> (i32, i32) {
    %c0_i32 = arith.constant 0 : i32
    %c0_i32_0 = arith.constant 0 : i32
    return %arg0, %c0_i32 : i32, i32
  }
  func.func @transform_1(%arg0: i32) -> (i32, i32) {
    %c0_i32 = arith.constant 0 : i32
    %c0_i32_0 = arith.constant 0 : i32
    %c0_i32_1 = arith.constant 0 : i32
    return %c0_i32, %c0_i32_0 : i32, i32
  }
  func.func @transform_2(%arg0: i32) -> (i32, i32) {
    %c0_i32 = arith.constant 0 : i32
    %c0_i32_0 = arith.constant 0 : i32
    %c0_i32_1 = arith.constant 0 : i32
    return %c0_i32, %c0_i32_0 : i32, i32
  }
  func.func @transform_3(%arg0: i32) -> (i32, i32) {
    %c0_i32 = arith.constant 0 : i32
    %c0_i32_0 = arith.constant 0 : i32
    %c0_i32_1 = arith.constant 0 : i32
    return %c0_i32, %c0_i32_0 : i32, i32
  }
  func.func @transform_4(%arg0: i32) -> (i32, i32) {
    %c0_i32 = arith.constant 0 : i32
    %c0_i32_0 = arith.constant 0 : i32
    %c0_i32_1 = arith.constant 0 : i32
    return %c0_i32, %c0_i32_0 : i32, i32
  }
  func.func @transform_5(%arg0: i32) -> (i32, i32) {
    %c0_i32 = arith.constant 0 : i32
    %c0_i32_0 = arith.constant 0 : i32
    return %arg0, %c0_i32 : i32, i32
  }
}

</mosaic_0001>

<bundles_post_ra>
// kernel: encoder_forward.1
= control target key start
LH: loop header
LB: loop body
LE: loop exit
PB: predicated region body
PF: predicated region fallthrough
CT: control target
= control target key end

     0   :  { %v1093_v2 = vmov 0   ;;  %s1434_s0 = inlined_call_operand.vmem [shape: bf16[8,128], index: 0, kind: input, shape index: {}]   ;;  %s1435_s1 = inlined_call_operand.vmem [shape: bf16[128,512], index: 1, kind: input, shape index: {}]   ;;  %s1436_s2 = inlined_call_operand.vmem [shape: f32[1,512], index: 2, kind: input, shape index: {}]   ;;  %s1437_s3 = inlined_call_operand.vmem [shape: bf16[512,256], index: 3, kind: input, shape index: {}]   ;;  %s1438_s4 = inlined_call_operand.vmem [shape: f32[1,256], index: 4, kind: input, shape index: {}]   ;;  %s1439_s5 = inlined_call_operand.hbm [shape: f32[8,256], index: 5, kind: output, shape index: {}]  }
   0x1   :  { %v925_v0 = vld [vmem:[%s1435_s1 + $0x4] ss:$16 sps:$4 sm:$0xff]   ;;  %v927_v1 = vld [vmem:[%s1435_s1 + $0xc] ss:$16 sps:$4 sm:$0xff]   ;;  %269 = vmatprep.mubr.bf16.mxu0 %v1093_v2  ;;  %310 = vmatprep.mubr.bf16.mxu1 %v1093_v2  ;;  %v929_v3 = vld [vmem:[%s1435_s1] ss:$16 sps:$4 sm:$0xff]  }
   0x2   :  { %237 = vmatprep.subr.bf16.mxu0 %v925_v0  ;;  %v930_v4 = vld [vmem:[%s1435_s1 + $0x8] ss:$16 sps:$4 sm:$0xff]   ;;  %278 = vmatprep.subr.bf16.mxu1 %v927_v1  ;;  %v931_v5 = vld [vmem:[%s1435_s1 + $0x24] ss:$16 sps:$4 sm:$0xff]   ;;  %v933_v6 = vld [vmem:[%s1435_s1 + $0x2c] ss:$16 sps:$4 sm:$0xff]  }
   0x3   :  { %238 = vmatpush1.bf16.msra.mxu0 %v929_v3  ;;  %279 = vmatpush1.bf16.msra.mxu1 %v930_v4  ;;  %v935_v7 = vld [vmem:[%s1435_s1 + $0x20] ss:$16 sps:$4 sm:$0xff]   ;;  %v936_v8 = vld [vmem:[%s1435_s1 + $0x28] ss:$16 sps:$4 sm:$0xff]   ;;  %v937_v9 = vld [vmem:[%s1435_s1 + $0x44] ss:$16 sps:$4 sm:$0xff]  }
   0x4   :  { %239 = vmatprep.subr.bf16.mxu0 %v931_v5  ;;  %280 = vmatprep.subr.bf16.mxu1 %v933_v6  ;;  %v939_v10 = vld [vmem:[%s1435_s1 + $0x4c] ss:$16 sps:$4 sm:$0xff]   ;;  %v941_v11 = vld [vmem:[%s1435_s1 + $0x40] ss:$16 sps:$4 sm:$0xff]   ;;  %v942_v12 = vld [vmem:[%s1435_s1 + $0x48] ss:$16 sps:$4 sm:$0xff]  }
   0x5   :  { %v943_v13 = vld [vmem:[%s1435_s1 + $0x64] ss:$16 sps:$4 sm:$0xff]   ;;  %v945_v14 = vld [vmem:[%s1435_s1 + $0x6c] ss:$16 sps:$4 sm:$0xff]   ;;  %v947_v15 = vld [vmem:[%s1435_s1 + $0x60] ss:$16 sps:$4 sm:$0xff]  }
   0x6   :  { %v948_v16 = vld [vmem:[%s1435_s1 + $0x68] ss:$16 sps:$4 sm:$0xff]   ;;  %v949_v17 = vld [vmem:[%s1435_s1 + $0x84] ss:$16 sps:$4 sm:$0xff]   ;;  %v951_v18 = vld [vmem:[%s1435_s1 + $0x8c] ss:$16 sps:$4 sm:$0xff]  }
   0x7   :  { %240 = vmatpush1.bf16.msra.mxu0 %v935_v7  ;;  %281 = vmatpush1.bf16.msra.mxu1 %v936_v8  ;;  %v953_v19 = vld [vmem:[%s1435_s1 + $0x80] ss:$16 sps:$4 sm:$0xff]   ;;  %v954_v20 = vld [vmem:[%s1435_s1 + $0x88] ss:$16 sps:$4 sm:$0xff]   ;;  %v955_v21 = vld [vmem:[%s1435_s1 + $0xa4] ss:$16 sps:$4 sm:$0xff]  }
   0x8   :  { %241 = vmatprep.subr.bf16.mxu0 %v937_v9  ;;  %282 = vmatprep.subr.bf16.mxu1 %v939_v10  ;;  %v957_v22 = vld [vmem:[%s1435_s1 + $0xac] ss:$16 sps:$4 sm:$0xff]   ;;  %v959_v23 = vld [vmem:[%s1435_s1 + $0xa0] ss:$16 sps:$4 sm:$0xff]   ;;  %v960_v24 = vld [vmem:[%s1435_s1 + $0xa8] ss:$16 sps:$4 sm:$0xff]  }
   0x9   :  { %v961_v25 = vld [vmem:[%s1435_s1 + $0xc4] ss:$16 sps:$4 sm:$0xff]   ;;  %v963_v26 = vld [vmem:[%s1435_s1 + $0xcc] ss:$16 sps:$4 sm:$0xff]   ;;  %v965_v27 = vld [vmem:[%s1435_s1 + $0xc0] ss:$16 sps:$4 sm:$0xff]  }
   0xa   :  { %v966_v28 = vld [vmem:[%s1435_s1 + $0xc8] ss:$16 sps:$4 sm:$0xff]   ;;  %v967_v29 = vld [vmem:[%s1435_s1 + $0xe4] ss:$16 sps:$4 sm:$0xff]   ;;  %v969_v30 = vld [vmem:[%s1435_s1 + $0xec] ss:$16 sps:$4 sm:$0xff]  }
   0xb   :  { %242 = vmatpush1.bf16.msra.mxu0 %v941_v11  ;;  %283 = vmatpush1.bf16.msra.mxu1 %v942_v12  ;;  %v971_v31 = vld [vmem:[%s1435_s1 + $0xe0] ss:$16 sps:$4 sm:$0xff]   ;;  %v972_v32 = vld [vmem:[%s1435_s1 + $0xe8] ss:$16 sps:$4 sm:$0xff]   ;;  %v975_v33 = vld [vmem:[%s1437_s3 + $0x4] ss:$8 sps:$4 sm:$0xff]  }
   0xc   :  { %243 = vmatprep.subr.bf16.mxu0 %v943_v13  ;;  %284 = vmatprep.subr.bf16.mxu1 %v945_v14  ;;  %v978_v34 = vld [vmem:[%s1437_s3 + $0x104] ss:$8 sps:$4 sm:$0xff]   ;;  %v22_v35 = vld [vmem:[%s1434_s0] sm:$0xf]  ;;  %v981_v38 = vld [vmem:[%s1437_s3 + $0x14] ss:$8 sps:$4 sm:$0xff]  }
   0xd   :  { %v973_v36 = vld [vmem:[%s1437_s3] ss:$8 sps:$4 sm:$0xff]   ;;  %v984_v39 = vld [vmem:[%s1437_s3 + $0x114] ss:$8 sps:$4 sm:$0xff]   ;;  %v979_v40 = vld [vmem:[%s1437_s3 + $0x10] ss:$8 sps:$4 sm:$0xff]  }
   0xe   :  { %v976_v37 = vld [vmem:[%s1437_s3 + $0x100] ss:$8 sps:$4 sm:$0xff]   ;;  %v982_v41 = vld [vmem:[%s1437_s3 + $0x110] ss:$8 sps:$4 sm:$0xff]   ;;  %v987_v42 = vld [vmem:[%s1437_s3 + $0x24] ss:$8 sps:$4 sm:$0xff]  }
   0xf   :  { %244 = vmatpush1.bf16.msra.mxu0 %v947_v15  ;;  %285 = vmatpush1.bf16.msra.mxu1 %v948_v16  ;;  %v990_v43 = vld [vmem:[%s1437_s3 + $0x124] ss:$8 sps:$4 sm:$0xff]   ;;  %v985_v44 = vld [vmem:[%s1437_s3 + $0x20] ss:$8 sps:$4 sm:$0xff]   ;;  %v993_v46 = vld [vmem:[%s1437_s3 + $0x34] ss:$8 sps:$4 sm:$0xff]  }
  0x10   :  { %245 = vmatprep.subr.bf16.mxu0 %v949_v17  ;;  %286 = vmatprep.subr.bf16.mxu1 %v951_v18  ;;  %v988_v45 = vld [vmem:[%s1437_s3 + $0x120] ss:$8 sps:$4 sm:$0xff]   ;;  %v996_v47 = vld [vmem:[%s1437_s3 + $0x134] ss:$8 sps:$4 sm:$0xff]   ;;  %v991_v48 = vld [vmem:[%s1437_s3 + $0x30] ss:$8 sps:$4 sm:$0xff]  }
  0x11   :  { %v994_v49 = vld [vmem:[%s1437_s3 + $0x130] ss:$8 sps:$4 sm:$0xff]   ;;  %v999_v50 = vld [vmem:[%s1437_s3 + $0x44] ss:$8 sps:$4 sm:$0xff]   ;;  %v997_v52 = vld [vmem:[%s1437_s3 + $0x40] ss:$8 sps:$4 sm:$0xff]  }
  0x12   :  { %v1002_v51 = vld [vmem:[%s1437_s3 + $0x144] ss:$8 sps:$4 sm:$0xff]   ;;  %v1000_v53 = vld [vmem:[%s1437_s3 + $0x140] ss:$8 sps:$4 sm:$0xff]   ;;  %v1005_v54 = vld [vmem:[%s1437_s3 + $0x54] ss:$8 sps:$4 sm:$0xff]  }
  0x13   :  { %246 = vmatpush1.bf16.msra.mxu0 %v953_v19  ;;  %287 = vmatpush1.bf16.msra.mxu1 %v954_v20  ;;  %v1008_v55 = vld [vmem:[%s1437_s3 + $0x154] ss:$8 sps:$4 sm:$0xff]   ;;  %v1003_v56 = vld [vmem:[%s1437_s3 + $0x50] ss:$8 sps:$4 sm:$0xff]   ;;  %v1011_v58 = vld [vmem:[%s1437_s3 + $0x64] ss:$8 sps:$4 sm:$0xff]  }
  0x14   :  { %247 = vmatprep.subr.bf16.mxu0 %v955_v21  ;;  %288 = vmatprep.subr.bf16.mxu1 %v957_v22  ;;  %v1006_v57 = vld [vmem:[%s1437_s3 + $0x150] ss:$8 sps:$4 sm:$0xff]   ;;  %v1014_v59 = vld [vmem:[%s1437_s3 + $0x164] ss:$8 sps:$4 sm:$0xff]   ;;  %v1009_v60 = vld [vmem:[%s1437_s3 + $0x60] ss:$8 sps:$4 sm:$0xff]  }
  0x15   :  { %v1012_v61 = vld [vmem:[%s1437_s3 + $0x160] ss:$8 sps:$4 sm:$0xff]   ;;  %v1017_v62 = vld [vmem:[%s1437_s3 + $0x74] ss:$8 sps:$4 sm:$0xff]   ;;  %v1015_v0 = vld [vmem:[%s1437_s3 + $0x70] ss:$8 sps:$4 sm:$0xff]  }
  0x16   :  { %v1020_v63 = vld [vmem:[%s1437_s3 + $0x174] ss:$8 sps:$4 sm:$0xff]   ;;  %v1018_v1 = vld [vmem:[%s1437_s3 + $0x170] ss:$8 sps:$4 sm:$0xff]   ;;  %v1023_v2 = vld [vmem:[%s1437_s3 + $0x84] ss:$8 sps:$4 sm:$0xff]  }
  0x17   :  { %248 = vmatpush1.bf16.msra.mxu0 %v959_v23  ;;  %289 = vmatpush1.bf16.msra.mxu1 %v960_v24  ;;  %v1026_v3 = vld [vmem:[%s1437_s3 + $0x184] ss:$8 sps:$4 sm:$0xff]  }
  0x18   :  { %249 = vmatprep.subr.bf16.mxu0 %v961_v25  ;;  %290 = vmatprep.subr.bf16.mxu1 %v963_v26 }
  0x1b   :  { %250 = vmatpush1.bf16.msra.mxu0 %v965_v27  ;;  %291 = vmatpush1.bf16.msra.mxu1 %v966_v28 }
  0x1c   :  { %251 = vmatprep.subr.bf16.mxu0 %v967_v29  ;;  %292 = vmatprep.subr.bf16.mxu1 %v969_v30 }
  0x1f   :  { %252 = vmatpush1.bf16.msra.mxu0 %v971_v31  ;;  %293 = vmatpush1.bf16.msra.mxu1 %v972_v32 }
  0x20   :  { %723 = vmatprep.subr.bf16.mxu1 %v975_v33  ;;  %764 = vmatprep.subr.bf16.mxu0 %v978_v34 }
  0x22   :  { %270 = vmatmul.mubr.bf16.vlgmr.msra.gmra.mrb[0].mxu0 %v22_v35  ;;  %311 = vmatmul.mubr.bf16.vlgmr.msra.gmra.mrb[0].mxu1 %v22_v35 }
  0x23   :  { %724 = vmatpush1.bf16.msra.mxu1 %v973_v36  ;;  %765 = vmatpush1.bf16.msra.mxu0 %v976_v37 }
  0x24   :  { %725 = vmatprep.subr.bf16.mxu1 %v981_v38  ;;  %766 = vmatprep.subr.bf16.mxu0 %v984_v39 }
  0x27   :  { %726 = vmatpush1.bf16.msra.mxu1 %v979_v40  ;;  %767 = vmatpush1.bf16.msra.mxu0 %v982_v41 }
  0x28   :  { %727 = vmatprep.subr.bf16.mxu1 %v987_v42  ;;  %768 = vmatprep.subr.bf16.mxu0 %v990_v43 }
  0x2b   :  { %728 = vmatpush1.bf16.msra.mxu1 %v985_v44  ;;  %769 = vmatpush1.bf16.msra.mxu0 %v988_v45 }
  0x2c   :  { %729 = vmatprep.subr.bf16.mxu1 %v993_v46  ;;  %770 = vmatprep.subr.bf16.mxu0 %v996_v47 }
  0x2f   :  { %730 = vmatpush1.bf16.msra.mxu1 %v991_v48  ;;  %771 = vmatpush1.bf16.msra.mxu0 %v994_v49 }
  0x30   :  { %731 = vmatprep.subr.bf16.mxu1 %v999_v50  ;;  %772 = vmatprep.subr.bf16.mxu0 %v1002_v51 }
  0x33   :  { %732 = vmatpush1.bf16.msra.mxu1 %v997_v52  ;;  %773 = vmatpush1.bf16.msra.mxu0 %v1000_v53 }
  0x34   :  { %733 = vmatprep.subr.bf16.mxu1 %v1005_v54  ;;  %774 = vmatprep.subr.bf16.mxu0 %v1008_v55 }
  0x37   :  { %734 = vmatpush1.bf16.msra.mxu1 %v1003_v56  ;;  %775 = vmatpush1.bf16.msra.mxu0 %v1006_v57 }
  0x38   :  { %735 = vmatprep.subr.bf16.mxu1 %v1011_v58  ;;  %776 = vmatprep.subr.bf16.mxu0 %v1014_v59 }
  0x3b   :  { %736 = vmatpush1.bf16.msra.mxu1 %v1009_v60  ;;  %777 = vmatpush1.bf16.msra.mxu0 %v1012_v61 }
  0x3c   :  { %737 = vmatprep.subr.bf16.mxu1 %v1017_v62  ;;  %778 = vmatprep.subr.bf16.mxu0 %v1020_v63 }
  0x3d   :  { %10 = vsyncpa [#allocation3], 0  ;;  %v1021_v4 = vld [vmem:[%s1437_s3 + $0x80] ss:$8 sps:$4 sm:$0xff]   ;;  %v1029_v6 = vld [vmem:[%s1437_s3 + $0x94] ss:$8 sps:$4 sm:$0xff]   ;;  %v57_v34 = vlaneseq }
  0x3e   :  { %v1024_v5 = vld [vmem:[%s1437_s3 + $0x180] ss:$8 sps:$4 sm:$0xff]   ;;  %v1032_v7 = vld [vmem:[%s1437_s3 + $0x194] ss:$8 sps:$4 sm:$0xff]   ;;  %v1027_v8 = vld [vmem:[%s1437_s3 + $0x90] ss:$8 sps:$4 sm:$0xff]  }
  0x3f   :  { %738 = vmatpush1.bf16.msra.mxu1 %v1015_v0  ;;  %779 = vmatpush1.bf16.msra.mxu0 %v1018_v1  ;;  %v1030_v9 = vld [vmem:[%s1437_s3 + $0x190] ss:$8 sps:$4 sm:$0xff]   ;;  %v1035_v10 = vld [vmem:[%s1437_s3 + $0xa4] ss:$8 sps:$4 sm:$0xff]   ;;  %v1033_v12 = vld [vmem:[%s1437_s3 + $0xa0] ss:$8 sps:$4 sm:$0xff]  }
  0x40   :  { %739 = vmatprep.subr.bf16.mxu1 %v1023_v2  ;;  %780 = vmatprep.subr.bf16.mxu0 %v1026_v3  ;;  %v1038_v11 = vld [vmem:[%s1437_s3 + $0x1a4] ss:$8 sps:$4 sm:$0xff]   ;;  %v1036_v13 = vld [vmem:[%s1437_s3 + $0x1a0] ss:$8 sps:$4 sm:$0xff]   ;;  %v1041_v14 = vld [vmem:[%s1437_s3 + $0xb4] ss:$8 sps:$4 sm:$0xff]  }
  0x41   :  { %v1044_v15 = vld [vmem:[%s1437_s3 + $0x1b4] ss:$8 sps:$4 sm:$0xff]   ;;  %v1039_v16 = vld [vmem:[%s1437_s3 + $0xb0] ss:$8 sps:$4 sm:$0xff]   ;;  %v1047_v18 = vld [vmem:[%s1437_s3 + $0xc4] ss:$8 sps:$4 sm:$0xff]  }
  0x42   :  { %v1042_v17 = vld [vmem:[%s1437_s3 + $0x1b0] ss:$8 sps:$4 sm:$0xff]   ;;  %v1050_v19 = vld [vmem:[%s1437_s3 + $0x1c4] ss:$8 sps:$4 sm:$0xff]   ;;  %v1045_v20 = vld [vmem:[%s1437_s3 + $0xc0] ss:$8 sps:$4 sm:$0xff]  }
  0x43   :  { %740 = vmatpush1.bf16.msra.mxu1 %v1021_v4  ;;  %781 = vmatpush1.bf16.msra.mxu0 %v1024_v5  ;;  %v1048_v21 = vld [vmem:[%s1437_s3 + $0x1c0] ss:$8 sps:$4 sm:$0xff]   ;;  %v1053_v22 = vld [vmem:[%s1437_s3 + $0xd4] ss:$8 sps:$4 sm:$0xff]   ;;  %v1051_v24 = vld [vmem:[%s1437_s3 + $0xd0] ss:$8 sps:$4 sm:$0xff]  }
  0x44   :  { %741 = vmatprep.subr.bf16.mxu1 %v1029_v6  ;;  %782 = vmatprep.subr.bf16.mxu0 %v1032_v7  ;;  %v1056_v23 = vld [vmem:[%s1437_s3 + $0x1d4] ss:$8 sps:$4 sm:$0xff]   ;;  %v1054_v25 = vld [vmem:[%s1437_s3 + $0x1d0] ss:$8 sps:$4 sm:$0xff]   ;;  %v1059_v26 = vld [vmem:[%s1437_s3 + $0xe4] ss:$8 sps:$4 sm:$0xff]  }
  0x45   :  { %v1062_v27 = vld [vmem:[%s1437_s3 + $0x1e4] ss:$8 sps:$4 sm:$0xff]   ;;  %v1057_v28 = vld [vmem:[%s1437_s3 + $0xe0] ss:$8 sps:$4 sm:$0xff]   ;;  %v1065_v30 = vld [vmem:[%s1437_s3 + $0xf4] ss:$8 sps:$4 sm:$0xff]  }
  0x46   :  { %v1060_v29 = vld [vmem:[%s1437_s3 + $0x1e0] ss:$8 sps:$4 sm:$0xff]   ;;  %v1068_v31 = vld [vmem:[%s1437_s3 + $0x1f4] ss:$8 sps:$4 sm:$0xff]   ;;  %v1063_v32 = vld [vmem:[%s1437_s3 + $0xf0] ss:$8 sps:$4 sm:$0xff]  }
  0x47   :  { %742 = vmatpush1.bf16.msra.mxu1 %v1027_v8  ;;  %783 = vmatpush1.bf16.msra.mxu0 %v1030_v9  ;;  %v1066_v33 = vld [vmem:[%s1437_s3 + $0x1f0] ss:$8 sps:$4 sm:$0xff]   ;;  %v58_v35 = vshrl.u32 %v57_v34, 7  ;;  %v55_v38 = vld [vmem:[%s1436_s2] sm:$0xf]  ;;  %s1094_s29 = smov [#allocation2]  }
  0x48   :  { %743 = vmatprep.subr.bf16.mxu1 %v1035_v10  ;;  %784 = vmatprep.subr.bf16.mxu0 %v1038_v11  ;;  %v391_v1 = vld [vmem:[%s1438_s4] sm:$0x3]  ;;  %s815_s30 = sshll.u32 %s1094_s29, 4  ;;  %s816_s30 = int_to_ptr.vmem [resolvable:$true] %s815_s30 }
  0x49   :  { %v59_v36 = vsub.s32 0, %v58_v35  ;;  %v67_v37 = vsub.s32 2, %v58_v35  ;;  %v63_v39 = vsub.s32 1, %v58_v35  ;;  %v71_v40 = vsub.s32 3, %v58_v35  ;;  %s1069_s4 = scalar_lea.vmem %s816_s30, 256  ;;  %p1074_p1 = scmp.lt.s32.totalorder %s816_s30, %s816_s30 }
  0x4a   :  { %p1070_p0 = scmp.ne.s32.totalorder %s816_s30, %s1069_s4  ;;  %p1075_p2 = scmp.lt.s32.totalorder %s1069_s4, %s1069_s4 }
  0x4b   :  { %744 = vmatpush1.bf16.msra.mxu1 %v1033_v12  ;;  %785 = vmatpush1.bf16.msra.mxu0 %v1036_v13  ;;  %v60_v41 = vrot.slane %v55_v38, %v59_v36  ;;  %v68_v42 = vrot.slane %v55_v38, %v67_v37  ;;  %v64_v43 = vrot.slane %v55_v38, %v63_v39 }
  0x4c   :  { %745 = vmatprep.subr.bf16.mxu1 %v1041_v14  ;;  %786 = vmatprep.subr.bf16.mxu0 %v1044_v15  ;;  %v72_v44 = vrot.slane %v55_v38, %v71_v40  ;;  %v396_v2 = vrot.slane %v391_v1, %v59_v36  ;;  %v400_v3 = vrot.slane %v391_v1, %v63_v39  ;;  %p1076_p3 = por %p1075_p2, %p1074_p1 }
  0x4e   :  { %p1077_p4 = pnand %p1076_p3, %p1070_p0 }
  0x4f   :  { %746 = vmatpush1.bf16.msra.mxu1 %v1039_v16  ;;  %787 = vmatpush1.bf16.msra.mxu0 %v1042_v17 }
  0x50   :  { %747 = vmatprep.subr.bf16.mxu1 %v1047_v18  ;;  %788 = vmatprep.subr.bf16.mxu0 %v1050_v19 }
  0x53   :  { %748 = vmatpush1.bf16.msra.mxu1 %v1045_v20  ;;  %789 = vmatpush1.bf16.msra.mxu0 %v1048_v21 }
  0x54   :  { %749 = vmatprep.subr.bf16.mxu1 %v1053_v22  ;;  %790 = vmatprep.subr.bf16.mxu0 %v1056_v23 }
  0x57   :  { %750 = vmatpush1.bf16.msra.mxu1 %v1051_v24  ;;  %791 = vmatpush1.bf16.msra.mxu0 %v1054_v25 }
  0x58   :  { %751 = vmatprep.subr.bf16.mxu1 %v1059_v26  ;;  %792 = vmatprep.subr.bf16.mxu0 %v1062_v27 }
  0x5b   :  { %752 = vmatpush1.bf16.msra.mxu1 %v1057_v28  ;;  %793 = vmatpush1.bf16.msra.mxu0 %v1060_v29 }
  0x5c   :  { %753 = vmatprep.subr.bf16.mxu1 %v1065_v30  ;;  %794 = vmatprep.subr.bf16.mxu0 %v1068_v31 }
  0x5f   :  { %754 = vmatpush1.bf16.msra.mxu1 %v1063_v32  ;;  %795 = vmatpush1.bf16.msra.mxu0 %v1066_v33 }
  0xf5   :  { %v271_v45 = vpop.f32.mrb[0].mxu0  ;;  %v312_v46 = vpop.f32.mrb[0].mxu1 }
  0xf6   :  { %v272_v47 = vadd.f32 %v271_v45, %v60_v41  ;;  %v313_v48 = vadd.f32 %v312_v46, %v68_v42  ;;  %v273_v49 = vpop.f32.mrb[1].mxu0  ;;  %v314_v50 = vpop.f32.mrb[1].mxu1 }
  0xf7   :  { %v274_v51 = vadd.f32 %v273_v49, %v64_v43  ;;  %v315_v52 = vadd.f32 %v314_v50, %v72_v44  ;;  %v275_v53 = vpop.f32.mrb[2].mxu0  ;;  %v316_v54 = vpop.f32.mrb[2].mxu1 }
  0xf8   :  { %v319_v55 = vmax.f32 %v272_v47, 0.0  ;;  %v321_v56 = vmax.f32 %v313_v48, 0.0  ;;  %v276_v57 = vpop.f32.mrb[3].mxu0  ;;  %v317_v58 = vpop.f32.mrb[3].mxu1 }
  0xf9   :  { %v320_v59 = vmax.f32 %v274_v51, 0.0  ;;  %v322_v60 = vmax.f32 %v315_v52, 0.0 }
  0xfa   :  { %v325_v61 = vpack.c.bf16 %v321_v56, %v321_v56  ;;  %v323_v0 = vpack.c.bf16 %v319_v55, %v319_v55 }
  0xfb   :  { %v324_v62 = vpack.c.bf16 %v320_v59, %v320_v59  ;;  %v326_v63 = vpack.c.bf16 %v322_v60, %v322_v60 }
  0xfd   :  { %755 = vmatprep.mubr.bf16.mxu1 %v324_v62  ;;  %796 = vmatprep.mubr.bf16.mxu0 %v326_v63 }
  0xfe   :  { %756 = vmatmul.mubr.bf16.vlgmr.msra.gmra.mrb[4].mxu1 %v323_v0  ;;  %797 = vmatmul.mubr.bf16.vlgmr.msra.gmra.mrb[4].mxu0 %v325_v61 }
 0x1d1   :  { %v757_v4 = vpop.f32.mrb[4].mxu1  ;;  %v798_v5 = vpop.f32.mrb[4].mxu0 }
 0x1d2   :  { %v758_v6 = vadd.f32 %v757_v4, %v396_v2  ;;  %v759_v7 = vpop.f32.mrb[5].mxu1  ;;  %v800_v8 = vpop.f32.mrb[5].mxu0 }
 0x1d3   :  { %v760_v9 = vadd.f32 %v759_v7, %v400_v3  ;;  %v761_v10 = vpop.f32.mrb[6].mxu1  ;;  %v802_v11 = vpop.f32.mrb[6].mxu0 }
 0x1d4   :  { %v799_v12 = vadd.f32 %v798_v5, %v758_v6  ;;  %v762_v13 = vpop.f32.mrb[7].mxu1  ;;  %v803_v14 = vpop.f32.mrb[7].mxu0 }
 0x1d5   :  { %v801_v15 = vadd.f32 %v800_v8, %v760_v9 }
 0x1d6   :  { %v805_v16 = vmax.f32 %v799_v12, 0.0 }
 0x1d7   :  { %v806_v17 = vmax.f32 %v801_v15, 0.0 }
 0x1d8   :  { %807 = vst [vmem:[#allocation2] sm:$0xff] %v805_v16 }
 0x1d9   :  { %808 = vst [vmem:[#allocation2 + $0x8] sm:$0xff] %v806_v17 }
 0x1da   :  { %1080 = shalt.err (!%p1077_p4)
}
 0x1db   :  { %s1081_s8 = scalar_lea.hbm %s1439_s5, 256 }
 0x1dc   :  { %p1082_p5 = scmp.ne.s32.totalorder %s1439_s5, %s1081_s8  ;;  %p1085_p6 = scmp.lt.u32.totalorder %s1081_s8, %s1439_s5 }
 0x1de   :  { %p1087_p7 = pnand %p1085_p6, %p1082_p5 }
 0x1e0   :  { %1090 = shalt.err (!%p1087_p7)
}
 0x1e1   :  { %818 = dma.vmem_to_hbm [thread:$0]  %s816_s30, 256, %s1439_s5, [#allocation3]  }
 0x1e2   :  { %1091 = dma.done.wait [#allocation3], 256  }
 0x1e3   :  { %1092 = vsyncadd [#allocation3], 4294967040 }
 0x1e4   :  { %822 = vsyncpa [#allocation3], 1 }

</bundles_post_ra>
